<compile_context>
chip_gen: v7x
topology: tpu7x:2x2x1
jax: 0.10.0
libtpu: 0.0.40
codegen_flags: <defaults>
</compile_context>

<pallas_src>
import functools

import jax
import jax.numpy as jnp
from jax import lax
from jax.experimental import pallas as pl
from jax.experimental.pallas import tpu as pltpu


def _round_up(x, m):
    return ((x + m - 1) // m) * m


def _meanmax_linear_kernel(mb_ref, w_ref, b_ref, out_ref, *, K, D, rows_per_chunk):
    """mb_ref: (TN, K*D) lane-dense mailbox tile; w_ref: (2D, D); b_ref: (1, D) f32;
    out_ref: (TN, D)."""
    n_chunks = out_ref.shape[0] // rows_per_chunk
    inv_k = 1.0 / K

    @pl.loop(0, n_chunks)
    def _(c):
        r0 = pl.multiple_of(c * rows_per_chunk, rows_per_chunk)
        rows = pl.ds(r0, rows_per_chunk)

        # Running max / f32 sum over the K messages of this row chunk.  Each
        # slice is a (rows_per_chunk, D) window of the lane-dense block, so the
        # accumulators stay small enough to live in vregs (no spilling even
        # when the DMA block is several MiB).
        # TODO(synk): for D < 128 on v7x a log2(K) lane-halving tree fold over
        # the (rows, K*D) slab (pltpu.roll for the sub-128 folds) would cut the
        # VALU op count; the kernel is DMA-bound on v5e/v6e so it is skipped.
        first = mb_ref[rows, 0:D]
        acc_max = first
        acc_sum = first.astype(jnp.float32)
        if K <= 64:
            for k in range(1, K):
                v = mb_ref[rows, k * D:(k + 1) * D]
                acc_max = jnp.maximum(acc_max, v)
                acc_sum = acc_sum + v.astype(jnp.float32)
        else:
            # TODO(synk): for very large K*D per node, a second ("arbitrary")
            # grid axis over K with VMEM scratch accumulators would keep node
            # tiles large under v7x's 64 MiB VMEM.
            def kbody(k, carry):
                amax, asum = carry
                v = mb_ref[rows, pl.ds(k * D, D)]
                return jnp.maximum(amax, v), asum + v.astype(jnp.float32)

            acc_max, acc_sum = lax.fori_loop(1, K, kbody, (acc_max, acc_sum))

        mean_agg = acc_sum * inv_k

        # concat([mean, max]) @ W.T + b as a single (rows, 2D) @ (2D, D) matmul.
        cat = jnp.concatenate([mean_agg, acc_max.astype(jnp.float32)], axis=-1)
        out = jnp.dot(cat, w_ref[...].astype(jnp.float32),
                      preferred_element_type=jnp.float32) + b_ref[...]
        out_ref[rows, :] = out.astype(out_ref.dtype)


def _plan_tiles(N, K, D, mb_dtype, w_dtype):
    """Pick (node_tile, rows_per_chunk, vmem_limit_bytes)."""
    mb_item = jnp.dtype(mb_dtype).itemsize
    w_item = jnp.dtype(w_dtype).itemsize

    try:
        vmem_cap = int(pltpu.get_tpu_info().vmem_capacity_bytes)
    except Exception:
        vmem_cap = 64 << 20  # conservative (v7x-sized) fallback
    small_vmem = vmem_cap <= (64 << 20)  # v7x-like: 64 MiB VMEM, 2 TCs, fast HBM

    # Bigger DMA blocks amortize the ~0.35 us/grid-step overhead; v7x's faster
    # HBM (~3.2 TB/s) wants ~8 MiB, v5e/v6e reach roofline around 4 MiB.
    target_block_bytes = (8 << 20) if small_vmem else (4 << 20)

    kd = K * D
    kd_pad = _round_up(kd, 128)   # VMEM lane padding of the (lane-dense) input block
    d_pad = _round_up(D, 128)     # VMEM lane padding of the output block

    node_hbm_bytes = kd * mb_item
    per_node_vmem = 2 * kd_pad * mb_item + 2 * d_pad * mb_item  # dbl-buffered in+out

    # Resident weight / bias buffers (counted double-buffered, conservatively).
    w_vmem = 2 * _round_up(2 * D, 16) * d_pad * w_item
    b_vmem = 2 * 8 * d_pad * 4
    vmem_budget = max((vmem_cap // 2) - w_vmem - b_vmem, 4 << 20)

    nt = max(1, target_block_bytes // node_hbm_bytes)        # amortize step overhead
    nt = min(nt, max(1, vmem_budget // per_node_vmem))       # fit the VMEM budget
    nt = max(8, (nt // 8) * 8)
    nt = min(nt, _round_up(N, 8))                            # don't tile past N

    # 2-TensorCore (v7x-like) chips: keep >= 4 grid steps so the "parallel"
    # node axis gives each core >= 2 blocks to pipeline.  Single-TC chips
    # (v5e/v6e) get no clamp.
    if small_vmem and N >= 64:
        nt = min(nt, max(8, _round_up(pl.cdiv(N, 4), 8)))

    # In-kernel compute chunk: keep the (rows, D) f32 accumulators around
    # ~8 vregs each (no spilling), independent of the DMA block size.
    rc = max(8, min(nt, max(8, (8192 // max(D, 1)) // 8 * 8)))
    nt = max(rc, (nt // rc) * rc)

    vmem_need = nt * per_node_vmem + w_vmem + b_vmem
    vmem_limit = int(min(vmem_cap, max(32 << 20, vmem_need + (8 << 20))))
    return nt, rc, vmem_limit


def meanmax_aggregation_2(mailbox, weight, bias):
    """mailbox: (N, K, D); weight: (D, 2D) [nn.Linear (out, in) layout]; bias: (D,).

    Returns h_updated: (N, D) = Linear(concat([mean_k, max_k], -1))."""
    N, K, D = mailbox.shape
    assert weight.shape == (D, 2 * D), "weight must be the (out, in) nn.Linear weight"
    assert bias.shape == (D,)

    # concat([mean, max]) @ W.T + b  ==  the PyTorch Linear applied to the concat.
    # Keep the weight at its native dtype (bf16 weights stay bf16-resident).
    w_cat = jnp.asarray(weight).T                    # (2D, D)
    b2d = jnp.asarray(bias, dtype=jnp.float32).reshape(1, D)

    # Lane-dense, fully contiguous view of the mailbox (free: identical HBM layout).
    mb2d = jnp.asarray(mailbox).reshape(N, K * D)

    node_tile, rows_per_chunk, vmem_limit = _plan_tiles(
        N, K, D, mailbox.dtype, w_cat.dtype)
    grid = (pl.cdiv(N, node_tile),)

    kernel = functools.partial(
        _meanmax_linear_kernel, K=K, D=D, rows_per_chunk=rows_per_chunk)

    mb_item = jnp.dtype(mailbox.dtype).itemsize
    cost = pl.CostEstimate(
        flops=4 * N * D * D + 4 * N * K * D,
        transcendentals=0,
        bytes_accessed=N * K * D * mb_item + N * D * mb_item
        + 2 * D * D * jnp.dtype(w_cat.dtype).itemsize,
    )

    return pl.pallas_call(
        kernel,
        out_shape=jax.ShapeDtypeStruct((N, D), mailbox.dtype),
        grid_spec=pltpu.PrefetchScalarGridSpec(
            num_scalar_prefetch=0,
            grid=grid,
            in_specs=[
                pl.BlockSpec((node_tile, K * D), lambda i: (i, 0)),  # mailbox tile
                pl.BlockSpec((2 * D, D), lambda i: (0, 0)),          # W_cat (resident)
                pl.BlockSpec((1, D), lambda i: (0, 0)),              # bias   (resident)
            ],
            out_specs=pl.BlockSpec((node_tile, D), lambda i: (i, 0)),
        ),
        compiler_params=pltpu.CompilerParams(
            dimension_semantics=("parallel",),
            vmem_limit_bytes=vmem_limit,
        ),
        cost_estimate=cost,
    )(mb2d, w_cat, b2d)


if __name__ == "__main__":
    key = jax.random.PRNGKey(0)
    k_mb, k_w, k_b = jax.random.split(key, 3)

    # Small DGL-mailbox-like shapes: N nodes, K messages/node, D feats.
    # N is deliberately not a multiple of the node tile to exercise the ragged
    # final block (handled without any padding copy of the mailbox).
    N, K, D = 20, 8, 32
    mailbox = jax.random.normal(k_mb, (N, K, D), dtype=jnp.float32)
    weight = jax.random.normal(k_w, (D, 2 * D), dtype=jnp.float32) / jnp.sqrt(2.0 * D)
    bias = jax.random.normal(k_b, (D,), dtype=jnp.float32)

    h_updated = jax.block_until_ready(meanmax_aggregation_2(mailbox, weight, bias))

    # Pure-JAX reference matching the PyTorch forward.
    mean_agg = jnp.mean(mailbox, axis=1)
    max_agg = jnp.max(mailbox, axis=1)
    ref = jnp.concatenate([mean_agg, max_agg], axis=-1) @ weight.T + bias

    assert h_updated.shape == (N, D)
    assert jnp.allclose(h_updated, ref, atol=1e-3, rtol=1e-3), "mismatch vs reference"
    print("KERNEL_OK")
</pallas_src>

<mosaic_0001>
module attributes {stable_mosaic.version = 11 : i64} {
  func.func @_meanmax_linear_kernel(%arg0: i32, %arg1: memref<24x256xf32, #tpu.memory_space<vmem>>, %arg2: memref<64x32xf32, #tpu.memory_space<vmem>>, %arg3: memref<1x32xf32, #tpu.memory_space<vmem>>, %arg4: memref<24x32xf32, #tpu.memory_space<vmem>>) attributes {dimension_semantics = [#tpu.dimension_semantics<parallel>], iteration_bounds = array<i64: 1>, scalar_prefetch = 0 : i64, scratch_operands = 0 : i64, tpu.core_type = #tpu.core_type<tc>, window_params = [{transform_indices = @transform_0, window_bounds = array<i64: 24, 256>}, {pipeline_mode = #tpu.pipeline_mode<synchronous>, transform_indices = @transform_1, window_bounds = array<i64: 64, 32>}, {pipeline_mode = #tpu.pipeline_mode<synchronous>, transform_indices = @transform_2, window_bounds = array<i64: 1, 32>}, {transform_indices = @transform_3, window_bounds = array<i64: 24, 32>}]} {
    %c0_i32 = arith.constant 0 : i32
    %c1_i32 = arith.constant 1 : i32
    %0 = arith.muli %c0_i32, %c1_i32 : i32
    %c0_i32_0 = arith.constant 0 : i32
    %1 = arith.addi %c0_i32_0, %0 : i32
    %c24_i32 = arith.constant 24 : i32
    %2 = arith.muli %1, %c24_i32 : i32
    %3 = tpu.assume_multiple %2, 24 : i32
    %4 = arith.index_cast %3 : i32 to index
    %c0 = arith.constant 0 : index
    %5 = vector.load %arg1[%4, %c0] : memref<24x256xf32, #tpu.memory_space<vmem>>, vector<24x32xf32>
    %6 = arith.index_cast %3 : i32 to index
    %c32 = arith.constant 32 : index
    %7 = vector.load %arg1[%6, %c32] : memref<24x256xf32, #tpu.memory_space<vmem>>, vector<24x32xf32>
    %8 = arith.maximumf %5, %7 : vector<24x32xf32>
    %9 = arith.addf %5, %7 : vector<24x32xf32>
    %10 = arith.index_cast %3 : i32 to index
    %c64 = arith.constant 64 : index
    %11 = vector.load %arg1[%10, %c64] : memref<24x256xf32, #tpu.memory_space<vmem>>, vector<24x32xf32>
    %12 = arith.maximumf %8, %11 : vector<24x32xf32>
    %13 = arith.addf %9, %11 : vector<24x32xf32>
    %14 = arith.index_cast %3 : i32 to index
    %c96 = arith.constant 96 : index
    %15 = vector.load %arg1[%14, %c96] : memref<24x256xf32, #tpu.memory_space<vmem>>, vector<24x32xf32>
    %16 = arith.maximumf %12, %15 : vector<24x32xf32>
    %17 = arith.addf %13, %15 : vector<24x32xf32>
    %18 = arith.index_cast %3 : i32 to index
    %c128 = arith.constant 128 : index
    %19 = vector.load %arg1[%18, %c128] : memref<24x256xf32, #tpu.memory_space<vmem>>, vector<24x32xf32>
    %20 = arith.maximumf %16, %19 : vector<24x32xf32>
    %21 = arith.addf %17, %19 : vector<24x32xf32>
    %22 = arith.index_cast %3 : i32 to index
    %c160 = arith.constant 160 : index
    %23 = vector.load %arg1[%22, %c160] : memref<24x256xf32, #tpu.memory_space<vmem>>, vector<24x32xf32>
    %24 = arith.maximumf %20, %23 : vector<24x32xf32>
    %25 = arith.addf %21, %23 : vector<24x32xf32>
    %26 = arith.index_cast %3 : i32 to index
    %c192 = arith.constant 192 : index
    %27 = vector.load %arg1[%26, %c192] : memref<24x256xf32, #tpu.memory_space<vmem>>, vector<24x32xf32>
    %28 = arith.maximumf %24, %27 : vector<24x32xf32>
    %29 = arith.addf %25, %27 : vector<24x32xf32>
    %30 = arith.index_cast %3 : i32 to index
    %c224 = arith.constant 224 : index
    %31 = vector.load %arg1[%30, %c224] : memref<24x256xf32, #tpu.memory_space<vmem>>, vector<24x32xf32>
    %32 = arith.maximumf %28, %31 : vector<24x32xf32>
    %33 = arith.addf %29, %31 : vector<24x32xf32>
    %cst = arith.constant 1.250000e-01 : f32
    %34 = vector.broadcast %cst : f32 to vector<24x32xf32>
    %35 = arith.mulf %33, %34 : vector<24x32xf32>
    %36 = tpu.concatenate %35, %32 in 1 : vector<24x32xf32>, vector<24x32xf32> -> vector<24x64xf32>
    %c0_1 = arith.constant 0 : index
    %c0_2 = arith.constant 0 : index
    %37 = vector.load %arg2[%c0_1, %c0_2] : memref<64x32xf32, #tpu.memory_space<vmem>>, vector<64x32xf32>
    %cst_3 = arith.constant dense<0.000000e+00> : vector<24x32xf32>
    %38 = tpu.matmul %36, %37, %cst_3 {dimension_numbers = #tpu.dot_dimension_numbers<[1], [0], [0], [1], [0, 0, 1, 1], [], []>} : vector<24x64xf32>, vector<64x32xf32>, vector<24x32xf32> -> vector<24x32xf32>
    %c0_4 = arith.constant 0 : index
    %c0_5 = arith.constant 0 : index
    %39 = vector.load %arg3[%c0_4, %c0_5] : memref<1x32xf32, #tpu.memory_space<vmem>>, vector<1x32xf32>
    %40 = vector.broadcast %39 : vector<1x32xf32> to vector<24x32xf32>
    %41 = arith.addf %38, %40 : vector<24x32xf32>
    %42 = arith.index_cast %3 : i32 to index
    %c0_6 = arith.constant 0 : index
    %43 = vector.load %arg4[%42, %c0_6] : memref<24x32xf32, #tpu.memory_space<vmem>>, vector<24x32xf32>
    tpu.vector_store %arg4[%42, %c0_6], %41 {strides = array<i32>} : memref<24x32xf32, #tpu.memory_space<vmem>>, vector<24x32xf32>,
    %c1_i32_7 = arith.constant 1 : i32
    return
  }
  func.func @transform_0(%arg0: i32) -> (i32, i32) {
    %c0_i32 = arith.constant 0 : i32
    %c0_i32_0 = arith.constant 0 : i32
    return %arg0, %c0_i32 : i32, i32
  }
  func.func @transform_1(%arg0: i32) -> (i32, i32) {
    %c0_i32 = arith.constant 0 : i32
    %c0_i32_0 = arith.constant 0 : i32
    %c0_i32_1 = arith.constant 0 : i32
    return %c0_i32, %c0_i32_0 : i32, i32
  }
  func.func @transform_2(%arg0: i32) -> (i32, i32) {
    %c0_i32 = arith.constant 0 : i32
    %c0_i32_0 = arith.constant 0 : i32
    %c0_i32_1 = arith.constant 0 : i32
    return %c0_i32, %c0_i32_0 : i32, i32
  }
  func.func @transform_3(%arg0: i32) -> (i32, i32) {
    %c0_i32 = arith.constant 0 : i32
    %c0_i32_0 = arith.constant 0 : i32
    return %arg0, %c0_i32 : i32, i32
  }
}

</mosaic_0001>

<bundles_post_ra>
// kernel: tpu_custom_call.1
= control target key start
LH: loop header
LB: loop body
LE: loop exit
PB: predicated region body
PF: predicated region fallthrough
CT: control target
= control target key end

     0   :  { %s362_s16 = smov 96   ;;  %s514_s0 = inlined_call_operand.vmem [shape: f32[20,256], index: 0, kind: input, shape index: {}]   ;;  %s515_s1 = inlined_call_operand.vmem [shape: f32[64,32], index: 1, kind: input, shape index: {}]   ;;  %s516_s2 = inlined_call_operand.vmem [shape: f32[1,32], index: 2, kind: input, shape index: {}]   ;;  %s517_s3 = inlined_call_operand.hbm [shape: f32[20,32], index: 3, kind: output, shape index: {}]  }
   0x1   :  { %v394_v0 = vld [vmem:[%s514_s0 + $0x10] sm:$0xff]  ;;  %v399_v1 = vld [vmem:[%s514_s0] sm:$0xff] }
   0x2   :  { %26 = vrot.lane.b32.xlu0 %v394_v0, %s362_s16  ;;  %24 = vrot.lane.b32.xlu1 %v399_v1, %s362_s16  ;;  %v406_v2 = vld [vmem:[%s514_s0 + $0x20] sm:$0xff] }
   0x3   :  { %8 = vsyncpa [#allocation3], 0  ;;  %s363_s19 = smov 64   ;;  %s364_s20 = smov 32   ;;  %v422_v3 = vld [vmem:[%s514_s0 + $0x18] sm:$0xff]  ;;  %v430_v4 = vld [vmem:[%s514_s0 + $0x8] sm:$0xff] }
   0x4   :  { %v438_v5 = vld [vmem:[%s514_s0 + $0x28] sm:$0xff]  ;;  %v145_v6 = vld [vmem:[%s515_s1] sm:$0xff]  ;;  %v365_v8 = vmov 0.0|0.0   ;;  %v147_v10 = vld [vmem:[%s515_s1 + $0x10] sm:$0xff]  ;;  %vm366_vm0 = vmmov 0   ;;  %v367_v39 = vmov 0.0  }
   0x5   :  { %v146_v7 = vld [vmem:[%s515_s1 + $0x8] sm:$0xff]  ;;  %321 = vmatprep.subr.bf16.mxu1 %v365_v8  ;;  %v148_v11 = vld [vmem:[%s515_s1 + $0x18] sm:$0xff]  ;;  %309 = vmatprep.subr.bf16.mxu0 %v365_v8  ;;  %v149_v13 = vld [vmem:[%s515_s1 + $0x20] sm:$0xff]  ;;  %vm141_vm1 = vcmask 261120   ;;  %vm160_vm2 = vcmask 523264  }
   0x6   :  { %41 = vrot.lane.b32.xlu0 %v394_v0, %s363_s19  ;;  %28 = vrot.lane.b32.xlu1 %v406_v2, %s362_s16  ;;  %v310_v9 = vpack.c.bf16 %v146_v7, %v145_v6  ;;  %v313_v12 = vpack.c.bf16 %v148_v11, %v147_v10  ;;  %v150_v14 = vld [vmem:[%s515_s1 + $0x28] sm:$0xff]  ;;  %v151_v16 = vld [vmem:[%s515_s1 + $0x30] sm:$0xff] }
   0x7   :  { %v316_v15 = vpack.c.bf16 %v150_v14, %v149_v13  ;;  %v152_v17 = vld [vmem:[%s515_s1 + $0x38] sm:$0xff]  ;;  %303 = vmatprep.mubr.msk.f32.mxu1 %vm366_vm0, %v367_v39  ;;  %300 = vmatprep.mubr.msk.f32.mxu0 %vm366_vm0, %v367_v39 }
   0x8   :  { %325 = vmatpush3.bf16.msra.mxu1 %v310_v9  ;;  %311 = vmatpush3.bf16.msra.mxu0 %v310_v9  ;;  %v319_v18 = vpack.c.bf16 %v152_v17, %v151_v16 }
   0x9   :  { %322 = vmatprep.subr.bf16.mxu1 %v365_v8  ;;  %312 = vmatprep.subr.bf16.mxu0 %v365_v8 }
   0xa   :  { %56 = vrot.lane.b32.xlu0 %v394_v0, %s364_s20  ;;  %39 = vrot.lane.b32.xlu1 %v399_v1, %s363_s19 }
   0xc   :  { %326 = vmatpush3.bf16.msra.mxu1 %v313_v12  ;;  %314 = vmatpush3.bf16.msra.mxu0 %v313_v12 }
   0xd   :  { %323 = vmatprep.subr.bf16.mxu1 %v365_v8  ;;  %315 = vmatprep.subr.bf16.mxu0 %v365_v8 }
   0xe   :  { %43 = vrot.lane.b32.xlu0 %v406_v2, %s363_s19  ;;  %54 = vrot.lane.b32.xlu1 %v399_v1, %s364_s20 }
  0x10   :  { %327 = vmatpush3.bf16.msra.mxu1 %v316_v15  ;;  %317 = vmatpush3.bf16.msra.mxu0 %v316_v15 }
  0x11   :  { %324 = vmatprep.subr.bf16.mxu1 %v365_v8  ;;  %318 = vmatprep.subr.bf16.mxu0 %v365_v8 }
  0x12   :  { %58 = vrot.lane.b32.xlu0 %v406_v2, %s364_s20  ;;  %83 = vrot.lane.b32.xlu1 %v422_v3, %s362_s16 }
  0x14   :  { %328 = vmatpush3.bf16.msra.mxu1 %v319_v18  ;;  %320 = vmatpush3.bf16.msra.mxu0 %v319_v18 }
  0x16   :  { %98 = vrot.lane.b32.xlu0 %v422_v3, %s363_s19  ;;  %81 = vrot.lane.b32.xlu1 %v430_v4, %s362_s16 }
  0x1a   :  { %85 = vrot.lane.b32.xlu0 %v438_v5, %s362_s16  ;;  %113 = vrot.lane.b32.xlu1 %v422_v3, %s364_s20  ;;  %s368_s16 = smov [#allocation2]  }
  0x1b   :  { %s258_s17 = sshll.u32 %s368_s16, 4  ;;  %s259_s17 = int_to_ptr.vmem [resolvable:$true] %s258_s17 }
  0x1c   :  { %s338_s18 = scalar_lea.vmem %s259_s17, 384  ;;  %p343_p1 = scmp.lt.s32.totalorder %s259_s17, %s259_s17 }
  0x1d   :  { %p339_p0 = scmp.ne.s32.totalorder %s259_s17, %s338_s18  ;;  %p344_p2 = scmp.lt.s32.totalorder %s338_s18, %s338_s18 }
  0x1e   :  { %96 = vrot.lane.b32.xlu0 %v430_v4, %s363_s19  ;;  %100 = vrot.lane.b32.xlu1 %v438_v5, %s363_s19 }
  0x1f   :  { %p345_p3 = por %p344_p2, %p343_p1 }
  0x21   :  { %p346_p4 = pnand %p345_p3, %p339_p0 }
  0x22   :  { %111 = vrot.lane.b32.xlu0 %v430_v4, %s364_s20  ;;  %115 = vrot.lane.b32.xlu1 %v438_v5, %s364_s20 }
  0x74   :  { %v27_v19 = vpop.permute.xlu0 %26  ;;  %v25_v20 = vpop.permute.xlu1 %24 }
  0x75   :  { %v37_v21 = vadd.f32 %v27_v19, %v394_v0  ;;  %v36_v25 = vadd.f32 %v25_v20, %v399_v1  ;;  %v34_v30 = vmax.f32 %v394_v0, %v27_v19  ;;  %v33_v44 = vmax.f32 %v399_v1, %v25_v20 }
  0x78   :  { %v42_v22 = vpop.permute.xlu0 %41  ;;  %v29_v23 = vpop.permute.xlu1 %28 }
  0x79   :  { %v52_v24 = vadd.f32 %v42_v22, %v37_v21  ;;  %v38_v31 = vadd.f32 %v29_v23, %v406_v2  ;;  %v49_v34 = vmax.f32 %v34_v30, %v42_v22  ;;  %v35_v45 = vmax.f32 %v406_v2, %v29_v23 }
  0x7c   :  { %v57_v26 = vpop.permute.xlu0 %56  ;;  %v40_v27 = vpop.permute.xlu1 %39 }
  0x7d   :  { %v67_v28 = vadd.f32 %v57_v26, %v52_v24  ;;  %v51_v29 = vadd.f32 %v40_v27, %v36_v25  ;;  %v64_v37 = vmax.f32 %v49_v34, %v57_v26  ;;  %v48_v48 = vmax.f32 %v33_v44, %v40_v27  ;;  %v269_v25 = vld [vmem:[%s516_s2] ss:$0 sm:$0xff] }
  0x7f   :  { %v76_v38 = vadd.f32 %v422_v3, %v67_v28  ;;  %v73_v46 = vmax.f32 %v64_v37, %v422_v3 }
  0x80   :  { %v44_v32 = vpop.permute.xlu0 %43  ;;  %v55_v33 = vpop.permute.xlu1 %54 }
  0x81   :  { %v53_v35 = vadd.f32 %v44_v32, %v38_v31  ;;  %v66_v36 = vadd.f32 %v55_v33, %v51_v29  ;;  %v50_v51 = vmax.f32 %v35_v45, %v44_v32  ;;  %v63_v55 = vmax.f32 %v48_v48, %v55_v33 }
  0x83   :  { %v75_v47 = vadd.f32 %v430_v4, %v66_v36  ;;  %v72_v0 = vmax.f32 %v63_v55, %v430_v4 }
  0x84   :  { %v59_v40 = vpop.permute.xlu0 %58  ;;  %v84_v41 = vpop.permute.xlu1 %83 }
  0x85   :  { %v68_v42 = vadd.f32 %v59_v40, %v53_v35  ;;  %v94_v43 = vadd.f32 %v84_v41, %v76_v38  ;;  %v91_v52 = vmax.f32 %v73_v46, %v84_v41  ;;  %v65_v56 = vmax.f32 %v50_v51, %v59_v40 }
  0x87   :  { %v77_v58 = vadd.f32 %v438_v5, %v68_v42  ;;  %v74_v1 = vmax.f32 %v65_v56, %v438_v5 }
  0x88   :  { %v99_v49 = vpop.permute.xlu0 %98  ;;  %v82_v50 = vpop.permute.xlu1 %81 }
  0x89   :  { %v109_v53 = vadd.f32 %v99_v49, %v94_v43  ;;  %v93_v54 = vadd.f32 %v82_v50, %v75_v47  ;;  %v106_v57 = vmax.f32 %v91_v52, %v99_v49  ;;  %v90_v6 = vmax.f32 %v72_v0, %v82_v50 }
  0x8c   :  { %v86_v59 = vpop.permute.xlu0 %85  ;;  %v114_v60 = vpop.permute.xlu1 %113 }
  0x8d   :  { %v95_v61 = vadd.f32 %v86_v59, %v77_v58  ;;  %v121_v62 = vmax.f32 %v106_v57, %v114_v60  ;;  %v124_v63 = vadd.f32 %v114_v60, %v109_v53  ;;  %v92_v7 = vmax.f32 %v74_v1, %v86_v59 }
  0x8f   :  { %134 = vrot.lane.b32.xlu0 %v121_v62, %s364_s20  ;;  %v127_v4 = vmul.f32 0.125, %v124_v63 }
  0x90   :  { %v97_v2 = vpop.permute.xlu0 %96  ;;  %v101_v3 = vpop.permute.xlu1 %100 }
  0x91   :  { %v108_v8 = vadd.f32 %v97_v2, %v93_v54  ;;  %v110_v9 = vadd.f32 %v101_v3, %v95_v61  ;;  %v105_v10 = vmax.f32 %v90_v6, %v97_v2  ;;  %v107_v11 = vmax.f32 %v92_v7, %v101_v3 }
  0x94   :  { %v112_v12 = vpop.permute.xlu0 %111  ;;  %v116_v13 = vpop.permute.xlu1 %115 }
  0x95   :  { %v120_v14 = vmax.f32 %v105_v10, %v112_v12  ;;  %v122_v15 = vmax.f32 %v107_v11, %v116_v13  ;;  %v123_v17 = vadd.f32 %v112_v12, %v108_v8  ;;  %v125_v18 = vadd.f32 %v116_v13, %v110_v9 }
  0x97   :  { %132 = vrot.lane.b32.xlu1 %v120_v14, %s364_s20  ;;  %136 = vrot.lane.b32.xlu0 %v122_v15, %s364_s20  ;;  %v126_v19 = vmul.f32 0.125, %v123_v17  ;;  %v128_v20 = vmul.f32 0.125, %v125_v18 }
 0x101   :  { %v135_v5 = vpop.permute.xlu0 %134 }
 0x102   :  { %v143_v16 = vsel %vm141_vm1, %v127_v4, %v135_v5 }
 0x103   :  { %304 = vmatmul.mubr.msk.f32.vlgmr.msra.gmra.mrb[0].mxu1 %vm160_vm2, %v143_v16 }
 0x104   :  { %306 = vmatprep.mubr.msk.f32.mxu1 %vm366_vm0, %v367_v39 }
 0x109   :  { %v137_v21 = vpop.permute.xlu0 %136  ;;  %v133_v22 = vpop.permute.xlu1 %132 }
 0x10a   :  { %v144_v23 = vsel %vm141_vm1, %v128_v20, %v137_v21  ;;  %v142_v24 = vsel %vm141_vm1, %v126_v19, %v133_v22 }
 0x10b   :  { %301 = vmatmul.mubr.msk.f32.vlgmr.msra.gmra.mrb[0].mxu0 %vm160_vm2, %v142_v24  ;;  %307 = vmatmul.mubr.msk.f32.gmra.mrb[2].mxu1 %vm160_vm2, %v144_v23 }
 0x1d6   :  { %v241_v26 = vpop.f32.mrb[0].mxu1 }
 0x1d7   :  { %v242_v27 = vadd.f32 %v269_v25, %v241_v26  ;;  %v305_v28 = vpop.f32.mrb[1].mxu1 }
 0x1d9   :  { %251 = vst.msk [vmem:[#allocation2 + $0x8] sm:$0xff] %vm141_vm1, %v242_v27 }
 0x1de   :  { %v236_v29 = vpop.f32.mrb[0].mxu0  ;;  %v246_v30 = vpop.f32.mrb[2].mxu1 }
 0x1df   :  { %v237_v31 = vadd.f32 %v269_v25, %v236_v29  ;;  %v247_v32 = vadd.f32 %v269_v25, %v246_v30  ;;  %v302_v33 = vpop.f32.mrb[1].mxu0  ;;  %v308_v34 = vpop.f32.mrb[3].mxu1 }
 0x1e1   :  { %250 = vst.msk [vmem:[#allocation2] sm:$0xff] %vm141_vm1, %v237_v31  ;;  %252 = vst.msk [vmem:[#allocation2 + $0x10] sm:$0xff] %vm141_vm1, %v247_v32 }
 0x1e2   :  { %349 = shalt.err (!%p346_p4)
}
 0x1e3   :  { %s350_s20 = scalar_lea.hbm %s517_s3, 384 }
 0x1e4   :  { %p351_p5 = scmp.ne.s32.totalorder %s517_s3, %s350_s20  ;;  %p354_p6 = scmp.lt.u32.totalorder %s350_s20, %s517_s3 }
 0x1e6   :  { %p356_p7 = pnand %p354_p6, %p351_p5 }
 0x1e8   :  { %359 = shalt.err (!%p356_p7)
}
 0x1e9   :  { %s369_s25 = smov 128   ;;  %s370_s26 = smov 8  }
 0x1ea   :  { %264 = dma.vmem_to_hbm [thread:$0]  %s259_s17, 384, %s517_s3, [#allocation3], %s369_s25, %s369_s25, %s370_s26  }
 0x1eb   :  { %360 = dma.done.wait [#allocation3], 384  }
 0x1ec   :  { %361 = vsyncadd [#allocation3], 4294966912 }
 0x1ed   :  { %268 = vsyncpa [#allocation3], 1 }

</bundles_post_ra>
